<compile_context>
chip_gen: v7x
topology: tpu7x:2x2x1
jax: 0.10.0
libtpu: 0.0.40
codegen_flags: <defaults>
</compile_context>

<pallas_src>
import functools

import jax
import jax.numpy as jnp
from jax import lax
from jax.experimental import pallas as pl
from jax.experimental.pallas import tpu as pltpu

BN_EPS = 1e-5


# ---------------------------------------------------------------------------
# Kernel 1: batch-tiled BatchNorm statistics -> per-feature scale / shift
#   scale = gamma * rsqrt(var + eps)
#   shift = beta  - mean * scale
# One-pass sum / sum-of-squares accumulated across batch tiles in VMEM
# scratch; var = E[x^2] - mean^2 (biased), clamped at 0.
# ---------------------------------------------------------------------------
def bn_stats_kernel(x_ref, gamma_ref, beta_ref, scale_ref, shift_ref,
                    s1_ref, s2_ref, *, n_rows):
    i = pl.program_id(0)

    @pl.when(i == 0)
    def _():
        s1_ref[...] = jnp.zeros_like(s1_ref)
        s2_ref[...] = jnp.zeros_like(s2_ref)

    x = x_ref[...].astype(jnp.float32)                       # (TB, S)
    s1_ref[...] += jnp.sum(x, axis=0, keepdims=True)         # (1, S)
    s2_ref[...] += jnp.sum(x * x, axis=0, keepdims=True)     # (1, S)

    @pl.when(i == pl.num_programs(0) - 1)
    def _():
        n = jnp.float32(n_rows)
        mean = s1_ref[...] / n
        var = jnp.maximum(s2_ref[...] / n - mean * mean, 0.0)
        scale = gamma_ref[...] * lax.rsqrt(var + BN_EPS)
        scale_ref[...] = scale
        shift_ref[...] = beta_ref[...] - mean * scale


# ---------------------------------------------------------------------------
# Kernel 2: row-parallel MLP body (one batch tile per grid step)
#   xn = x * scale + shift
#   h1 = relu(xn @ W1 + b1); h2 = relu(h1 @ W2 + b2); out = tanh(h2 @ W3 + b3)
# ---------------------------------------------------------------------------
def actor_mlp_kernel(x_ref, scale_ref, shift_ref,
                     w1_ref, b1_ref, w2_ref, b2_ref, w3_ref, b3_ref,
                     o_ref):
    x = x_ref[...].astype(jnp.float32)                       # (TB, S)
    xn = x * scale_ref[...] + shift_ref[...]                 # folded BN affine

    h1 = jnp.dot(xn.astype(jnp.bfloat16), w1_ref[...],
                 preferred_element_type=jnp.float32) + b1_ref[...]
    h1 = jnp.maximum(h1, 0.0)

    h2 = jnp.dot(h1.astype(jnp.bfloat16), w2_ref[...],
                 preferred_element_type=jnp.float32) + b2_ref[...]
    h2 = jnp.maximum(h2, 0.0)

    out = jnp.dot(h2.astype(jnp.bfloat16), w3_ref[...],
                  preferred_element_type=jnp.float32) + b3_ref[...]
    o_ref[...] = jnp.tanh(out).astype(o_ref.dtype)


def _round_up(x, m):
    return -(-x // m) * m


def _choose_tile_b(B):
    # Large batches: 256-row tiles fill the MXU M-dimension and amortize the
    # ~0.35 us/step overhead. Small batches: single tile, padded to sublane (8).
    if B >= 256:
        return 256
    return max(8, _round_up(B, 8))


def actor_forward(state, params):
    """state: (B, S) float32. params: dict of pre-transposed weights/biases."""
    B, S = state.shape
    F1 = params["w1_t"].shape[1]
    F2 = params["w2_t"].shape[1]
    A = params["w3_t"].shape[1]

    # Pad batch once; the same padded buffer feeds both kernels.
    tile_b = _choose_tile_b(B)
    B_pad = _round_up(B, tile_b)
    x = state if B_pad == B else jnp.pad(state, ((0, B_pad - B), (0, 0)))
    grid = (B_pad // tile_b,)

    # ---- Stage 1: batch-tiled BN statistics (reduction over the grid) ----
    scale, shift = pl.pallas_call(
        functools.partial(bn_stats_kernel, n_rows=B),
        out_shape=(jax.ShapeDtypeStruct((1, S), jnp.float32),
                   jax.ShapeDtypeStruct((1, S), jnp.float32)),
        grid_spec=pltpu.PrefetchScalarGridSpec(
            num_scalar_prefetch=0,
            grid=grid,
            in_specs=[
                pl.BlockSpec((tile_b, S), lambda i: (i, 0)),   # x: streams
                pl.BlockSpec((1, S), lambda i: (0, 0)),        # gamma: resident
                pl.BlockSpec((1, S), lambda i: (0, 0)),        # beta: resident
            ],
            out_specs=(pl.BlockSpec((1, S), lambda i: (0, 0)),
                       pl.BlockSpec((1, S), lambda i: (0, 0))),
            scratch_shapes=[pltpu.VMEM((1, S), jnp.float32),
                            pltpu.VMEM((1, S), jnp.float32)],
        ),
        compiler_params=pltpu.CompilerParams(
            dimension_semantics=("arbitrary",),      # sequential reduction
            vmem_limit_bytes=32 * 1024 * 1024,
        ),
    )(x, params["bn_gamma"], params["bn_beta"])

    # ---- Stage 2: batch-tiled, row-parallel MLP ----
    # Lane-dense output: pad action dim to a full 128-lane group (unmasked vst).
    N3 = _round_up(max(A, 128), 128)
    w3 = params["w3_t"]
    b3 = params["b3"]
    if N3 != A:
        w3 = jnp.pad(w3, ((0, 0), (0, N3 - A)))
        b3 = jnp.pad(b3, ((0, 0), (0, N3 - A)))

    # bf16 matmul operands (f32 accumulation inside the kernel).
    w1 = params["w1_t"].astype(jnp.bfloat16)
    w2 = params["w2_t"].astype(jnp.bfloat16)
    w3 = w3.astype(jnp.bfloat16)

    out = pl.pallas_call(
        actor_mlp_kernel,
        out_shape=jax.ShapeDtypeStruct((B_pad, N3), jnp.float32),
        grid_spec=pltpu.PrefetchScalarGridSpec(
            num_scalar_prefetch=0,
            grid=grid,
            in_specs=[
                pl.BlockSpec((tile_b, S), lambda i: (i, 0)),   # x: streams
                pl.BlockSpec((1, S), lambda i: (0, 0)),        # scale: resident
                pl.BlockSpec((1, S), lambda i: (0, 0)),        # shift: resident
                pl.BlockSpec((S, F1), lambda i: (0, 0)),       # W1
                pl.BlockSpec((1, F1), lambda i: (0, 0)),       # b1
                pl.BlockSpec((F1, F2), lambda i: (0, 0)),      # W2
                pl.BlockSpec((1, F2), lambda i: (0, 0)),       # b2
                pl.BlockSpec((F2, N3), lambda i: (0, 0)),      # W3 (lane-padded)
                pl.BlockSpec((1, N3), lambda i: (0, 0)),       # b3 (lane-padded)
            ],
            out_specs=pl.BlockSpec((tile_b, N3), lambda i: (i, 0)),
        ),
        compiler_params=pltpu.CompilerParams(
            dimension_semantics=("parallel",),      # megacore sharding on v7x
            vmem_limit_bytes=32 * 1024 * 1024,      # safe within v7x's 64 MiB
        ),
    )(x, scale, shift, w1, params["b1"], w2, params["b2"], w3, b3)

    return out[:B, :A]


def init_actor_params(key, state_size, action_size, fc1_units=128, fc2_units=64):
    """Deterministic init mirroring Actor.__init__ / reset_parameters.

    hidden_init() uses weight.size(0) == out_features as 'fan_in' (as written
    in the reference), so lim = 1/sqrt(out_features) for fc1/fc2 weights.
    Biases keep PyTorch's default Linear init: U(-1/sqrt(in), 1/sqrt(in)).
    """
    ks = jax.random.split(key, 6)

    lim1 = 1.0 / jnp.sqrt(jnp.float32(fc1_units))
    lim2 = 1.0 / jnp.sqrt(jnp.float32(fc2_units))

    # Weights stored transposed: (in_features, out_features)
    w1_t = jax.random.uniform(ks[0], (state_size, fc1_units), jnp.float32, -lim1, lim1)
    w2_t = jax.random.uniform(ks[1], (fc1_units, fc2_units), jnp.float32, -lim2, lim2)
    w3_t = jax.random.uniform(ks[2], (fc2_units, action_size), jnp.float32, -3e-3, 3e-3)

    b1 = jax.random.uniform(ks[3], (1, fc1_units), jnp.float32,
                            -1.0 / jnp.sqrt(jnp.float32(state_size)),
                            1.0 / jnp.sqrt(jnp.float32(state_size)))
    b2 = jax.random.uniform(ks[4], (1, fc2_units), jnp.float32,
                            -1.0 / jnp.sqrt(jnp.float32(fc1_units)),
                            1.0 / jnp.sqrt(jnp.float32(fc1_units)))
    b3 = jax.random.uniform(ks[5], (1, action_size), jnp.float32,
                            -1.0 / jnp.sqrt(jnp.float32(fc2_units)),
                            1.0 / jnp.sqrt(jnp.float32(fc2_units)))

    bn_gamma = jnp.ones((1, state_size), jnp.float32)   # BatchNorm1d default affine
    bn_beta = jnp.zeros((1, state_size), jnp.float32)

    return dict(w1_t=w1_t, b1=b1, w2_t=w2_t, b2=b2, w3_t=w3_t, b3=b3,
                bn_gamma=bn_gamma, bn_beta=bn_beta)


def actor_reference(state, params):
    """Pure-JAX f32 reference matching the PyTorch forward."""
    x = state
    mean = jnp.mean(x, axis=0, keepdims=True)
    var = jnp.mean((x - mean) ** 2, axis=0, keepdims=True)
    xn = (x - mean) / jnp.sqrt(var + BN_EPS)
    xn = xn * params["bn_gamma"] + params["bn_beta"]
    h1 = jax.nn.relu(xn @ params["w1_t"] + params["b1"])
    h2 = jax.nn.relu(h1 @ params["w2_t"] + params["b2"])
    return jnp.tanh(h2 @ params["w3_t"] + params["b3"])


def _check(batch, state_size, action_size, key):
    k_param, k_state = jax.random.split(key)
    params = init_actor_params(k_param, state_size, action_size)
    state = jax.random.normal(k_state, (batch, state_size), jnp.float32)

    out = jax.block_until_ready(actor_forward(state, params))
    ref = actor_reference(state, params)

    assert out.shape == (batch, action_size)
    # bf16 matmul operands (f32 accumulation) -> slightly looser tolerance
    # than a pure-f32 comparison.
    assert jnp.allclose(out, ref, atol=5e-3, rtol=5e-2), (
        "mismatch vs reference: max abs diff = "
        f"{float(jnp.max(jnp.abs(out - ref)))}")


if __name__ == "__main__":
    key = jax.random.PRNGKey(0)
    k_small, k_big = jax.random.split(key)

    # Small batch: single-tile path.
    _check(batch=8, state_size=16, action_size=4, key=k_small)
    # Larger batch: multi-tile path (tile=256, batch padded 300 -> 512),
    # exercises the tiled BN reduction and the parallel MLP grid.
    _check(batch=300, state_size=16, action_size=4, key=k_big)

    print("KERNEL_OK")
</pallas_src>

<mosaic_0001>
module attributes {stable_mosaic.version = 11 : i64} {
  func.func @bn_stats_kernel(%arg0: i32, %arg1: memref<8x16xf32, #tpu.memory_space<vmem>>, %arg2: memref<1x16xf32, #tpu.memory_space<vmem>>, %arg3: memref<1x16xf32, #tpu.memory_space<vmem>>, %arg4: memref<1x16xf32, #tpu.memory_space<vmem>>, %arg5: memref<1x16xf32, #tpu.memory_space<vmem>>, %arg6: memref<1x16xf32, #tpu.memory_space<vmem>>, %arg7: memref<1x16xf32, #tpu.memory_space<vmem>>) attributes {dimension_semantics = [#tpu.dimension_semantics<arbitrary>], iteration_bounds = array<i64: 1>, scalar_prefetch = 0 : i64, scratch_operands = 2 : i64, tpu.core_type = #tpu.core_type<tc>, window_params = [{transform_indices = @transform_0, window_bounds = array<i64: 8, 16>}, {pipeline_mode = #tpu.pipeline_mode<synchronous>, transform_indices = @transform_1, window_bounds = array<i64: 1, 16>}, {pipeline_mode = #tpu.pipeline_mode<synchronous>, transform_indices = @transform_2, window_bounds = array<i64: 1, 16>}, {pipeline_mode = #tpu.pipeline_mode<synchronous>, transform_indices = @transform_3, window_bounds = array<i64: 1, 16>}, {pipeline_mode = #tpu.pipeline_mode<synchronous>, transform_indices = @transform_4, window_bounds = array<i64: 1, 16>}]} {
    %c0_i32 = arith.constant 0 : i32
    %0 = arith.cmpi eq, %arg0, %c0_i32 : i32
    %1 = arith.extui %0 : i1 to i32
    %c0_i32_0 = arith.constant 0 : i32
    %2 = arith.cmpi ne, %1, %c0_i32_0 : i32
    scf.if %2 {
      %cst_13 = arith.constant 0.000000e+00 : f32
      %18 = vector.broadcast %cst_13 : f32 to vector<1x16xf32>
      %c0_14 = arith.constant 0 : index
      %c0_15 = arith.constant 0 : index
      %19 = vector.load %arg6[%c0_14, %c0_15] : memref<1x16xf32, #tpu.memory_space<vmem>>, vector<1x16xf32>
      tpu.vector_store %arg6[%c0_14, %c0_15], %18 {strides = array<i32>} : memref<1x16xf32, #tpu.memory_space<vmem>>, vector<1x16xf32>,
      %cst_16 = arith.constant 0.000000e+00 : f32
      %20 = vector.broadcast %cst_16 : f32 to vector<1x16xf32>
      %c0_17 = arith.constant 0 : index
      %c0_18 = arith.constant 0 : index
      %21 = vector.load %arg7[%c0_17, %c0_18] : memref<1x16xf32, #tpu.memory_space<vmem>>, vector<1x16xf32>
      tpu.vector_store %arg7[%c0_17, %c0_18], %20 {strides = array<i32>} : memref<1x16xf32, #tpu.memory_space<vmem>>, vector<1x16xf32>,
    } else {
    }
    %c0 = arith.constant 0 : index
    %c0_1 = arith.constant 0 : index
    %3 = vector.load %arg1[%c0, %c0_1] : memref<8x16xf32, #tpu.memory_space<vmem>>, vector<8x16xf32>
    %c0_2 = arith.constant 0 : index
    %c0_3 = arith.constant 0 : index
    %4 = vector.load %arg6[%c0_2, %c0_3] : memref<1x16xf32, #tpu.memory_space<vmem>>, vector<1x16xf32>
    %cst = arith.constant dense<0.000000e+00> : vector<16xf32>
    %5 = vector.multi_reduction <add>, %3, %cst [0] : vector<8x16xf32> to vector<16xf32>
    %6 = vector.shape_cast %5 : vector<16xf32> to vector<1x16xf32>
    %7 = arith.addf %4, %6 : vector<1x16xf32>
    %c0_4 = arith.constant 0 : index
    %c0_5 = arith.constant 0 : index
    %8 = vector.load %arg6[%c0_4, %c0_5] : memref<1x16xf32, #tpu.memory_space<vmem>>, vector<1x16xf32>
    tpu.vector_store %arg6[%c0_4, %c0_5], %7 {strides = array<i32>} : memref<1x16xf32, #tpu.memory_space<vmem>>, vector<1x16xf32>,
    %c0_6 = arith.constant 0 : index
    %c0_7 = arith.constant 0 : index
    %9 = vector.load %arg7[%c0_6, %c0_7] : memref<1x16xf32, #tpu.memory_space<vmem>>, vector<1x16xf32>
    %10 = arith.mulf %3, %3 : vector<8x16xf32>
    %cst_8 = arith.constant dense<0.000000e+00> : vector<16xf32>
    %11 = vector.multi_reduction <add>, %10, %cst_8 [0] : vector<8x16xf32> to vector<16xf32>
    %12 = vector.shape_cast %11 : vector<16xf32> to vector<1x16xf32>
    %13 = arith.addf %9, %12 : vector<1x16xf32>
    %c0_9 = arith.constant 0 : index
    %c0_10 = arith.constant 0 : index
    %14 = vector.load %arg7[%c0_9, %c0_10] : memref<1x16xf32, #tpu.memory_space<vmem>>, vector<1x16xf32>
    tpu.vector_store %arg7[%c0_9, %c0_10], %13 {strides = array<i32>} : memref<1x16xf32, #tpu.memory_space<vmem>>, vector<1x16xf32>,
    %c0_i32_11 = arith.constant 0 : i32
    %15 = arith.cmpi eq, %arg0, %c0_i32_11 : i32
    %16 = arith.extui %15 : i1 to i32
    %c0_i32_12 = arith.constant 0 : i32
    %17 = arith.cmpi ne, %16, %c0_i32_12 : i32
    scf.if %17 {
      %c0_13 = arith.constant 0 : index
      %c0_14 = arith.constant 0 : index
      %18 = vector.load %arg6[%c0_13, %c0_14] : memref<1x16xf32, #tpu.memory_space<vmem>>, vector<1x16xf32>
      %cst_15 = arith.constant 8.000000e+00 : f32
      %19 = vector.broadcast %cst_15 : f32 to vector<1x16xf32>
      %20 = arith.divf %18, %19 : vector<1x16xf32>
      %c0_16 = arith.constant 0 : index
      %c0_17 = arith.constant 0 : index
      %21 = vector.load %arg7[%c0_16, %c0_17] : memref<1x16xf32, #tpu.memory_space<vmem>>, vector<1x16xf32>
      %cst_18 = arith.constant 8.000000e+00 : f32
      %22 = vector.broadcast %cst_18 : f32 to vector<1x16xf32>
      %23 = arith.divf %21, %22 : vector<1x16xf32>
      %24 = arith.mulf %20, %20 : vector<1x16xf32>
      %25 = arith.subf %23, %24 : vector<1x16xf32>
      %cst_19 = arith.constant 0.000000e+00 : f32
      %26 = vector.broadcast %cst_19 : f32 to vector<1x16xf32>
      %27 = arith.maximumf %25, %26 : vector<1x16xf32>
      %c0_20 = arith.constant 0 : index
      %c0_21 = arith.constant 0 : index
      %28 = vector.load %arg2[%c0_20, %c0_21] : memref<1x16xf32, #tpu.memory_space<vmem>>, vector<1x16xf32>
      %cst_22 = arith.constant 9.99999974E-6 : f32
      %29 = vector.broadcast %cst_22 : f32 to vector<1x16xf32>
      %30 = arith.addf %27, %29 : vector<1x16xf32>
      %31 = math.rsqrt %30 : vector<1x16xf32>
      %32 = arith.mulf %28, %31 : vector<1x16xf32>
      %c0_23 = arith.constant 0 : index
      %c0_24 = arith.constant 0 : index
      %33 = vector.load %arg4[%c0_23, %c0_24] : memref<1x16xf32, #tpu.memory_space<vmem>>, vector<1x16xf32>
      tpu.vector_store %arg4[%c0_23, %c0_24], %32 {strides = array<i32>} : memref<1x16xf32, #tpu.memory_space<vmem>>, vector<1x16xf32>,
      %c0_25 = arith.constant 0 : index
      %c0_26 = arith.constant 0 : index
      %34 = vector.load %arg3[%c0_25, %c0_26] : memref<1x16xf32, #tpu.memory_space<vmem>>, vector<1x16xf32>
      %35 = arith.mulf %20, %32 : vector<1x16xf32>
      %36 = arith.subf %34, %35 : vector<1x16xf32>
      %c0_27 = arith.constant 0 : index
      %c0_28 = arith.constant 0 : index
      %37 = vector.load %arg5[%c0_27, %c0_28] : memref<1x16xf32, #tpu.memory_space<vmem>>, vector<1x16xf32>
      tpu.vector_store %arg5[%c0_27, %c0_28], %36 {strides = array<i32>} : memref<1x16xf32, #tpu.memory_space<vmem>>, vector<1x16xf32>,
    } else {
    }
    return
  }
  func.func @transform_0(%arg0: i32) -> (i32, i32) {
    %c0_i32 = arith.constant 0 : i32
    %c0_i32_0 = arith.constant 0 : i32
    return %arg0, %c0_i32 : i32, i32
  }
  func.func @transform_1(%arg0: i32) -> (i32, i32) {
    %c0_i32 = arith.constant 0 : i32
    %c0_i32_0 = arith.constant 0 : i32
    %c0_i32_1 = arith.constant 0 : i32
    return %c0_i32, %c0_i32_0 : i32, i32
  }
  func.func @transform_2(%arg0: i32) -> (i32, i32) {
    %c0_i32 = arith.constant 0 : i32
    %c0_i32_0 = arith.constant 0 : i32
    %c0_i32_1 = arith.constant 0 : i32
    return %c0_i32, %c0_i32_0 : i32, i32
  }
  func.func @transform_3(%arg0: i32) -> (i32, i32) {
    %c0_i32 = arith.constant 0 : i32
    %c0_i32_0 = arith.constant 0 : i32
    %c0_i32_1 = arith.constant 0 : i32
    return %c0_i32, %c0_i32_0 : i32, i32
  }
  func.func @transform_4(%arg0: i32) -> (i32, i32) {
    %c0_i32 = arith.constant 0 : i32
    %c0_i32_0 = arith.constant 0 : i32
    %c0_i32_1 = arith.constant 0 : i32
    return %c0_i32, %c0_i32_0 : i32, i32
  }
}

</mosaic_0001>

<bundles_post_ra>
// kernel: tpu_custom_call.1
= control target key start
LH: loop header
LB: loop body
LE: loop exit
PB: predicated region body
PF: predicated region fallthrough
CT: control target
= control target key end

     0   :  { %10 = vsyncpa [#allocation5], 0  ;;  %s265_s0 = inlined_call_operand.hbm [shape: f32[8,16], index: 0, kind: input, shape index: {}]   ;;  %s266_s1 = inlined_call_operand.vmem [shape: f32[1,16], index: 1, kind: input, shape index: {}]   ;;  %s267_s2 = inlined_call_operand.vmem [shape: f32[1,16], index: 2, kind: input, shape index: {}]   ;;  %s268_s3 = inlined_call_operand.hbm [shape: f32[1,16], index: 3, kind: output, shape index: {0}]   ;;  %s269_s4 = inlined_call_operand.hbm [shape: f32[1,16], index: 4, kind: output, shape index: {1}]  }
   0x1   :  { %11 = vsyncpa [#allocation6], 0 }
   0x2   :  { %12 = vsyncpa [#allocation9], 0  ;;  %s188_s15 = smov [#allocation4]   ;;  %s116_s19 = scalar_lea.hbm %s265_s0, 128 }
   0x3   :  { %s19_s16 = sshll.u32 %s188_s15, 4  ;;  %p117_p0 = scmp.ne.s32.totalorder %s265_s0, %s116_s19  ;;  %s20_s16 = int_to_ptr.vmem [resolvable:$true] %s19_s16 }
   0x4   :  { %p120_p1 = scmp.lt.u32.totalorder %s116_s19, %s265_s0 }
   0x6   :  { %p122_p2 = pnand %p120_p1, %p117_p0 }
   0x8   :  { %125 = shalt.err (!%p122_p2)
}
   0x9   :  { %s126_s24 = scalar_lea.vmem %s20_s16, 128  ;;  %p131_p4 = scmp.lt.s32.totalorder %s20_s16, %s20_s16 }
   0xa   :  { %p127_p3 = scmp.ne.s32.totalorder %s20_s16, %s126_s24  ;;  %p132_p5 = scmp.lt.s32.totalorder %s126_s24, %s126_s24 }
   0xc   :  { %p133_p6 = por %p132_p5, %p131_p4 }
   0xe   :  { %p134_p7 = pnand %p133_p6, %p127_p3 }
  0x10   :  { %137 = shalt.err (!%p134_p7)
}
  0x11   :  { %22 = dma.hbm_to_vmem [thread:$0]  %s265_s0, 128, %s20_s16, [#allocation5]  }
  0x12   :  { %182 = dma.done.wait [#allocation5], 128  }
  0x13   :  { %183 = vsyncadd [#allocation5], 4294967168  ;;  %vm34_vm0 = vcmask 122880   ;;  %v189_v0 = vmov 0.0   ;;  %vm39_vm1 = vcmask 130048   ;;  %v37_v1 = vld [vmem:[#allocation4] sm:$0xff] }
  0x14   :  { %35 = vst.msk [vmem:[#allocation2] sm:$0x1] %vm34_vm0, %v189_v0  ;;  %36 = vst.msk [vmem:[#allocation3] sm:$0x1] %vm34_vm0, %v189_v0  ;;  %v40_v2 = vsel %vm39_vm1, %v37_v1, 0.0  ;;  %v51_v3 = vmul.f32 %v37_v1, %v37_v1  ;;  %s190_s28 = smov [#allocation7]  }
  0x15   :  { %v41_v4 = vrot.slane %v40_v2, 4  ;;  %v72_v29 = vld [vmem:[%s266_s1] sm:$0x1]  ;;  %s87_s29 = sshll.u32 %s190_s28, 4  ;;  %s191_s6 = smov [#allocation8]   ;;  %s88_s29 = int_to_ptr.vmem [resolvable:$true] %s87_s29 }
  0x16   :  { %v52_v5 = vsel %vm39_vm1, %v51_v3, 0.0  ;;  %v77_v32 = vld [vmem:[%s267_s2] sm:$0x1]  ;;  %s97_s7 = sshll.u32 %s191_s6, 4  ;;  %s138_s8 = scalar_lea.vmem %s88_s29, 16  ;;  %s98_s7 = int_to_ptr.vmem [resolvable:$true] %s97_s7 }
  0x17   :  { %v42_v6 = vadd.f32 %v41_v4, %v40_v2  ;;  %v53_v7 = vrot.slane %v52_v5, 4  ;;  %p139_p8 = scmp.ne.s32.totalorder %s88_s29, %s138_s8  ;;  %s142_s9 = scalar_lea.vmem %s88_s29, 32 }
  0x18   :  { %p143_p9 = scmp.lt.s32.totalorder %s88_s29, %s88_s29  ;;  %p144_p10 = scmp.lt.s32.totalorder %s142_s9, %s138_s8 }
  0x19   :  { %v43_v8 = vrot.slane %v42_v6, 2  ;;  %v54_v9 = vadd.f32 %v53_v7, %v52_v5 }
  0x1a   :  { %p145_p11 = por %p144_p10, %p143_p9 }
  0x1b   :  { %v44_v10 = vadd.f32 %v43_v8, %v42_v6  ;;  %v55_v11 = vrot.slane %v54_v9, 2  ;;  %v38_v14 = vld [vmem:[#allocation2] sm:$0x1]  ;;  %v50_v17 = vld [vmem:[#allocation3] sm:$0x1] }
  0x1c   :  { %p146_p12 = pnand %p145_p11, %p139_p8 }
  0x1d   :  { %v45_v12 = vrot.slane %v44_v10, 1  ;;  %v56_v13 = vadd.f32 %v55_v11, %v54_v9 }
  0x1f   :  { %v46_v15 = vadd.f32 %v45_v12, %v44_v10  ;;  %v57_v16 = vrot.slane %v56_v13, 1 }
  0x21   :  { %v47_v18 = vadd.f32 %v46_v15, %v38_v14  ;;  %v58_v19 = vadd.f32 %v57_v16, %v56_v13 }
  0x23   :  { %49 = vst.msk [vmem:[#allocation2] sm:$0x1] %vm34_vm0, %v47_v18  ;;  %v59_v20 = vadd.f32 %v58_v19, %v50_v17 }
  0x25   :  { %60 = vst.msk [vmem:[#allocation3] sm:$0x1] %vm34_vm0, %v59_v20 }
  0x2a   :  { %v64_v21 = vld [vmem:[#allocation2] sm:$0x1] }
  0x2b   :  { %v66_v22 = vmul.f32 0.125, %v64_v21 }
  0x2c   :  { %v67_v23 = vld [vmem:[#allocation3] sm:$0x1] }
  0x2d   :  { %v68_v24 = vmul.f32 0.125, %v67_v23  ;;  %v69_v25 = vmul.f32 %v66_v22, %v66_v22 }
  0x2f   :  { %v70_v26 = vsub.f32 %v68_v24, %v69_v25 }
  0x31   :  { %v71_v27 = vmax.f32 %v70_v26, 0.0 }
  0x33   :  { %v73_v28 = vadd.f32 1e-05, %v71_v27 }
  0x35   :  { %114 = vrsqrt.f32 %v73_v28 }
  0x3f   :  { %v115_v30 = vpop.eup %114 }
  0x40   :  { %v75_v31 = vmul.f32 %v115_v30, %v72_v29 }
  0x42   :  { %76 = vst.msk [vmem:[#allocation7] sm:$0x1] %vm34_vm0, %v75_v31  ;;  %v78_v33 = vmul.f32 %v75_v31, %v66_v22 }
  0x43   :  { %149 = shalt.err (!%p146_p12)
}
  0x44   :  { %s150_s11 = scalar_lea.hbm %s268_s3, 16 }
  0x45   :  { %p151_p13 = scmp.ne.s32.totalorder %s268_s3, %s150_s11  ;;  %p154_p0 = scmp.lt.u32.totalorder %s150_s11, %s268_s3 }
  0x47   :  { %p156_p1 = pnand %p154_p0, %p151_p13 }
  0x49   :  { %159 = shalt.err (!%p156_p1)
}
  0x4a   :  { %90 = dma.vmem_to_hbm [thread:$0]  %s88_s29, 16, %s268_s3, [#allocation6]   ;;  %v79_v34 = vsub.f32 %v77_v32, %v78_v33 }
  0x4b   :  { %s160_s17 = scalar_lea.vmem %s98_s7, 16  ;;  %s164_s18 = scalar_lea.vmem %s98_s7, 32 }
  0x4c   :  { %80 = vst.msk [vmem:[#allocation8] sm:$0x1] %vm34_vm0, %v79_v34  ;;  %p161_p2 = scmp.ne.s32.totalorder %s98_s7, %s160_s17  ;;  %p165_p3 = scmp.lt.s32.totalorder %s98_s7, %s98_s7 }
  0x4d   :  { %p166_p4 = scmp.lt.s32.totalorder %s164_s18, %s160_s17 }
  0x4f   :  { %p167_p5 = por %p166_p4, %p165_p3 }
  0x51   :  { %p168_p6 = pnand %p167_p5, %p161_p2 }
  0x53   :  { %171 = shalt.err (!%p168_p6)
}
  0x54   :  { %s172_s21 = scalar_lea.hbm %s269_s4, 16 }
  0x55   :  { %p173_p7 = scmp.ne.s32.totalorder %s269_s4, %s172_s21  ;;  %p176_p8 = scmp.lt.u32.totalorder %s172_s21, %s269_s4 }
  0x57   :  { %p178_p9 = pnand %p176_p8, %p173_p7 }
  0x59   :  { %181 = shalt.err (!%p178_p9)
}
  0x5a   :  { %100 = dma.vmem_to_hbm [thread:$0]  %s98_s7, 16, %s269_s4, [#allocation9]  }
  0x5b   :  { %184 = dma.done.wait [#allocation6], 16  }
  0x5c   :  { %185 = vsyncadd [#allocation6], 4294967280 }
  0x5d   :  { %186 = dma.done.wait [#allocation9], 16  }
  0x5e   :  { %187 = vsyncadd [#allocation9], 4294967280 }
  0x5f   :  { %107 = vsyncpa [#allocation5], 1 }
  0x60   :  { %108 = vsyncpa [#allocation6], 1 }
  0x61   :  { %109 = vsyncpa [#allocation9], 1 }

</bundles_post_ra>
